<compile_context>
chip_gen: v6e
topology: v6e:2x2x1
jax: 0.10.0
libtpu: 0.0.40
codegen_flags: <defaults>
</compile_context>

<pallas_src>
import functools
import math

import jax
import jax.numpy as jnp
from jax.experimental import pallas as pl
from jax.experimental.pallas import tpu as pltpu


_NEG_INF = -1e9
# Safe on v5e/v6e (128 MiB physical) and v7x (64 MiB physical); well above the
# default scoped limits (16/32 MiB).
_VMEM_LIMIT_BYTES = 64 * 1024 * 1024


# ---------------------------------------------------------------------------
# Spec / tiling helpers
# ---------------------------------------------------------------------------
def _const_spec(shape):
    """BlockSpec for a weight/bias resident across every grid step.

    Constant index_map -> fetched once; single-buffered (pl.Buffered(1)) so it
    does not pay for a second pipeline buffer.
    """
    index_map = lambda *_: (0,) * len(shape)
    try:
        return pl.BlockSpec(shape, index_map, pipeline_mode=pl.Buffered(1))
    except (TypeError, AttributeError):  # older jax without pipeline_mode
        return pl.BlockSpec(shape, index_map)


def _smem_spec():
    return pl.BlockSpec(memory_space=pltpu.MemorySpace.SMEM)


def _pick_tile(n, candidates):
    for c in candidates:
        if n % c == 0:
            return c
    return n  # full extent is always a legal block


def _layernorm_f32(x, alpha, beta, eps):
    """LayerNormalization of the reference module: scalar alpha/beta,
    unbiased (N-1) std, normalize by (std + eps).  One-pass variance."""
    d = x.shape[-1]
    mean = jnp.mean(x, axis=-1, keepdims=True)
    ex2 = jnp.mean(x * x, axis=-1, keepdims=True)
    var = jnp.maximum((ex2 - mean * mean) * (d / (d - 1.0)), 0.0)
    inv = pl.reciprocal(jnp.sqrt(var) + eps, approx=True)
    return alpha * (x - mean) * inv + beta


# ---------------------------------------------------------------------------
# Kernel A: LN1 + QKV projection (scale folded into Q), row-tiled over B*S
# ---------------------------------------------------------------------------
def _ln_qkv_kernel(x_ref, wq_ref, wk_ref, wv_ref, bq_ref, bk_ref, bv_ref,
                   a_ref, b_ref, q_ref, k_ref, v_ref, *,
                   eps: float, scale: float, compute_dtype):
    x = x_ref[...].astype(jnp.float32)                                  # (TR, D)
    xn = _layernorm_f32(x, a_ref[0], b_ref[0], eps).astype(compute_dtype)
    q = jnp.dot(xn, wq_ref[...], preferred_element_type=jnp.float32) + bq_ref[...]
    k = jnp.dot(xn, wk_ref[...], preferred_element_type=jnp.float32) + bk_ref[...]
    v = jnp.dot(xn, wv_ref[...], preferred_element_type=jnp.float32) + bv_ref[...]
    q_ref[...] = (q * scale).astype(q_ref.dtype)     # fold 1/sqrt(d_k) into Q
    k_ref[...] = k.astype(k_ref.dtype)
    v_ref[...] = v.astype(v_ref.dtype)


# ---------------------------------------------------------------------------
# Kernel B: flash attention (online softmax over KV tiles) + Wo + residual
# ---------------------------------------------------------------------------
def _flash_attn_kernel(x_ref, q_ref, k_ref, v_ref, mask_ref, wo_ref, bo_ref,
                       o_ref, m_sc, l_sc, acc_sc, *,
                       n_heads: int, d_k: int, compute_dtype):
    ki = pl.program_id(2)

    @pl.when(ki == 0)
    def _init():
        m_sc[...] = jnp.full(m_sc.shape, -jnp.inf, m_sc.dtype)
        l_sc[...] = jnp.zeros(l_sc.shape, l_sc.dtype)
        acc_sc[...] = jnp.zeros(acc_sc.shape, acc_sc.dtype)

    q = q_ref[0]                                     # (TQ, D), scale pre-folded
    k = k_ref[0]                                     # (TKV, D)
    v = v_ref[0]                                     # (TKV, D)
    masked = mask_ref[0] == 0.0                      # (1 or TQ, TKV) bool

    # TODO(synk): for d_k >= 128 a (H, S, d_k) layout would avoid sub-128 lane
    # slices below; kept as static slices for lowering robustness.
    for h in range(n_heads):                         # static unroll over heads
        s0 = h * d_k
        qh = q[:, s0:s0 + d_k]
        kh = k[:, s0:s0 + d_k]
        vh = v[:, s0:s0 + d_k]
        # q @ k^T expressed as a contraction over d_k (no transposed copy).
        s = jax.lax.dot_general(qh, kh, (((1,), (1,)), ((), ())),
                                preferred_element_type=jnp.float32)  # (TQ, TKV)
        s = jnp.where(masked, _NEG_INF, s)           # masked_fill(mask==0, -1e9)
        m_prev = m_sc[h]                                             # (TQ, 1)
        m_new = jnp.maximum(m_prev, jnp.max(s, axis=-1, keepdims=True))
        alpha = jnp.exp(m_prev - m_new)
        p = jnp.exp(s - m_new)
        # TODO(synk): training-mode attention dropout on `p` omitted (eval).
        l_sc[h] = alpha * l_sc[h] + jnp.sum(p, axis=-1, keepdims=True)
        pv = jax.lax.dot_general(p.astype(compute_dtype), vh,
                                 (((1,), (0,)), ((), ())),
                                 preferred_element_type=jnp.float32)  # (TQ, dk)
        acc_sc[:, s0:s0 + d_k] = alpha * acc_sc[:, s0:s0 + d_k] + pv
        m_sc[h] = m_new

    @pl.when(ki == pl.num_programs(2) - 1)
    def _finalize():
        # Normalize each head's context, then one full-width output projection.
        for h in range(n_heads):
            s0 = h * d_k
            acc_sc[:, s0:s0 + d_k] = acc_sc[:, s0:s0 + d_k] * pl.reciprocal(
                l_sc[h], approx=True)
        ctx = acc_sc[...].astype(compute_dtype)                       # (TQ, D)
        proj = jnp.dot(ctx, wo_ref[...],
                       preferred_element_type=jnp.float32) + bo_ref[...]
        # TODO(synk): residual dropout omitted (eval-mode forward).
        o_ref[0] = (x_ref[0].astype(jnp.float32) + proj).astype(o_ref.dtype)


# ---------------------------------------------------------------------------
# Kernel C: LN2 + FFN (W1/ReLU/W2) + residual, row-tiled over B*S
# ---------------------------------------------------------------------------
def _ffn_block_kernel(x_ref, w1_ref, b1_ref, w2_ref, b2_ref, a_ref, b_ref,
                      o_ref, *, eps: float, compute_dtype):
    x = x_ref[...].astype(jnp.float32)                                # (TR, D)
    xn = _layernorm_f32(x, a_ref[0], b_ref[0], eps).astype(compute_dtype)
    hid = jnp.dot(xn, w1_ref[...], preferred_element_type=jnp.float32) + b1_ref[...]
    hid = jnp.maximum(hid, 0.0).astype(compute_dtype)
    # TODO(synk): training-mode FFN / residual dropout omitted (eval forward).
    y = jnp.dot(hid, w2_ref[...], preferred_element_type=jnp.float32) + b2_ref[...]
    o_ref[...] = (x + y).astype(o_ref.dtype)


# ---------------------------------------------------------------------------
# Wrapper
# ---------------------------------------------------------------------------
def encoder_block_forward(x, src_mask, params, *, n_heads: int, eps: float = 1e-6,
                          compute_dtype=jnp.float32, training: bool = False):
    """Forward pass of EncoderBlock (eval mode).

    x:        [B, S, D]
    src_mask: key-padding mask [B, S] or [B, 1, S], or a full [B, S, S]
              attention mask; positions where mask == 0 get -1e9 pre-softmax.
    """
    assert not training, "TODO(synk): training-mode dropout needs in-kernel PRNG"
    B, S, D = x.shape
    assert D % n_heads == 0
    d_k = D // n_heads
    d_ff = params["w1"].shape[1]
    scale = 1.0 / math.sqrt(d_k)
    f32 = jnp.float32

    # Mask kept small: (B, 1, S) for key-padding masks (broadcast over queries
    # in-kernel) instead of a (B, S, S) block.
    m = src_mask
    if m.ndim == 2:
        m = m[:, None, :]
    mask_f = (m != 0).astype(f32)               # (B, 1, S) or (B, S, S)
    mq = mask_f.shape[1]

    cast_w = lambda w: w.astype(compute_dtype)
    wq, wk, wv, wo = (cast_w(params[n]) for n in ("wq", "wk", "wv", "wo"))
    w1, w2 = cast_w(params["w1"]), cast_w(params["w2"])
    bq = params["bq"].reshape(1, D).astype(f32)
    bk = params["bk"].reshape(1, D).astype(f32)
    bv = params["bv"].reshape(1, D).astype(f32)
    bo = params["bo"].reshape(1, D).astype(f32)
    b1 = params["b1"].reshape(1, d_ff).astype(f32)
    b2 = params["b2"].reshape(1, D).astype(f32)

    rows = B * S
    # TODO(synk): for awkward B*S, pad rows to a 256/512 multiple instead of
    # letting the row tile shrink (per-grid-step overhead dominates below ~256).
    tr = _pick_tile(rows, (512, 256, 128, 64, 32, 16, 8))
    row_spec = pl.BlockSpec((tr, D), lambda i: (i, 0))
    row_params = pltpu.CompilerParams(
        dimension_semantics=("parallel",), vmem_limit_bytes=_VMEM_LIMIT_BYTES)

    # ----------------- kernel A: LN1 + QKV projection ----------------------
    x2 = x.reshape(rows, D)
    q2, k2, v2 = pl.pallas_call(
        functools.partial(_ln_qkv_kernel, eps=eps, scale=scale,
                          compute_dtype=compute_dtype),
        out_shape=tuple(jax.ShapeDtypeStruct((rows, D), compute_dtype)
                        for _ in range(3)),
        grid_spec=pltpu.PrefetchScalarGridSpec(
            num_scalar_prefetch=0,
            grid=(rows // tr,),
            in_specs=[
                row_spec,
                _const_spec((D, D)), _const_spec((D, D)), _const_spec((D, D)),
                _const_spec((1, D)), _const_spec((1, D)), _const_spec((1, D)),
                _smem_spec(), _smem_spec(),                 # ln1 alpha / bias
            ],
            out_specs=[pl.BlockSpec((tr, D), lambda i: (i, 0))
                       for _ in range(3)],
        ),
        compiler_params=row_params,
    )(x2, wq, wk, wv, bq, bk, bv, params["ln1_a"], params["ln1_b"])
    q = q2.reshape(B, S, D)
    k = k2.reshape(B, S, D)
    v = v2.reshape(B, S, D)

    # ------- kernel B: flash attention + Wo projection + residual ----------
    tq = _pick_tile(S, (256, 128, 64, 32, 16, 8))
    tkv = _pick_tile(S, (512, 256, 128, 64, 32, 16, 8))
    q_map = lambda b, qi, ki: (b, qi, 0)
    kv_map = lambda b, qi, ki: (b, ki, 0)
    if mq == 1:
        mask_spec = pl.BlockSpec((1, 1, tkv), lambda b, qi, ki: (b, 0, ki))
    else:
        mask_spec = pl.BlockSpec((1, tq, tkv), lambda b, qi, ki: (b, qi, ki))

    x1 = pl.pallas_call(
        functools.partial(_flash_attn_kernel, n_heads=n_heads, d_k=d_k,
                          compute_dtype=compute_dtype),
        out_shape=jax.ShapeDtypeStruct((B, S, D), x.dtype),
        grid_spec=pltpu.PrefetchScalarGridSpec(
            num_scalar_prefetch=0,
            grid=(B, S // tq, S // tkv),
            in_specs=[
                pl.BlockSpec((1, tq, D), q_map),      # x (residual input)
                pl.BlockSpec((1, tq, D), q_map),      # q (pre-scaled)
                pl.BlockSpec((1, tkv, D), kv_map),    # k
                pl.BlockSpec((1, tkv, D), kv_map),    # v
                mask_spec,                            # key mask
                _const_spec((D, D)),                  # wo
                _const_spec((1, D)),                  # bo
            ],
            out_specs=pl.BlockSpec((1, tq, D), q_map),
            scratch_shapes=[
                pltpu.VMEM((n_heads, tq, 1), jnp.float32),   # running max
                pltpu.VMEM((n_heads, tq, 1), jnp.float32),   # running sum
                pltpu.VMEM((tq, D), jnp.float32),            # per-head context
            ],
        ),
        compiler_params=pltpu.CompilerParams(
            dimension_semantics=("parallel", "parallel", "arbitrary"),
            vmem_limit_bytes=_VMEM_LIMIT_BYTES),
    )(x, q, k, v, mask_f, wo, bo)

    # --------------- kernel C: LN2 + FFN + residual -------------------------
    x1f = x1.reshape(rows, D)
    out = pl.pallas_call(
        functools.partial(_ffn_block_kernel, eps=eps,
                          compute_dtype=compute_dtype),
        out_shape=jax.ShapeDtypeStruct((rows, D), x.dtype),
        grid_spec=pltpu.PrefetchScalarGridSpec(
            num_scalar_prefetch=0,
            grid=(rows // tr,),
            in_specs=[
                row_spec,
                _const_spec((D, d_ff)), _const_spec((1, d_ff)),
                _const_spec((d_ff, D)), _const_spec((1, D)),
                _smem_spec(), _smem_spec(),                 # ln2 alpha / bias
            ],
            out_specs=pl.BlockSpec((tr, D), lambda i: (i, 0)),
        ),
        compiler_params=row_params,
    )(x1f, w1, b1, w2, b2, params["ln2_a"], params["ln2_b"])

    return out.reshape(B, S, D)


# ---------------------------------------------------------------------------
# Pure-JAX reference (mirrors the PyTorch module in eval mode)
# ---------------------------------------------------------------------------
def _layernorm_ref(x, alpha, beta, eps):
    mean = jnp.mean(x, axis=-1, keepdims=True)
    var = jnp.sum((x - mean) ** 2, axis=-1, keepdims=True) / (x.shape[-1] - 1)
    return alpha * (x - mean) / (jnp.sqrt(var) + eps) + beta


def encoder_block_ref(x, key_mask, p, *, n_heads, eps=1e-6):
    B, S, D = x.shape
    d_k = D // n_heads
    xn = _layernorm_ref(x, p["ln1_a"], p["ln1_b"], eps)
    q = xn @ p["wq"] + p["bq"]
    k = xn @ p["wk"] + p["bk"]
    v = xn @ p["wv"] + p["bv"]
    q = q.reshape(B, S, n_heads, d_k).transpose(0, 2, 1, 3)
    k = k.reshape(B, S, n_heads, d_k).transpose(0, 2, 1, 3)
    v = v.reshape(B, S, n_heads, d_k).transpose(0, 2, 1, 3)
    scores = (q @ jnp.swapaxes(k, -1, -2)) / math.sqrt(d_k)
    scores = jnp.where(key_mask[:, None, None, :] == 0, -1e9, scores)
    attn = jax.nn.softmax(scores, axis=-1)
    o = (attn @ v).transpose(0, 2, 1, 3).reshape(B, S, D)
    x = x + (o @ p["wo"] + p["bo"])
    xn2 = _layernorm_ref(x, p["ln2_a"], p["ln2_b"], eps)
    y = jax.nn.relu(xn2 @ p["w1"] + p["b1"]) @ p["w2"] + p["b2"]
    return x + y


if __name__ == "__main__":
    # Small shapes consistent with the module: batch=2, seq=8, d_model=32, h=4, d_ff=64.
    B, S, D, H, DFF = 2, 8, 32, 4, 64
    ks = jax.random.split(jax.random.PRNGKey(0), 13)
    sc = 0.125
    params = {
        "wq": jax.random.normal(ks[0], (D, D), jnp.float32) * sc,
        "wk": jax.random.normal(ks[1], (D, D), jnp.float32) * sc,
        "wv": jax.random.normal(ks[2], (D, D), jnp.float32) * sc,
        "wo": jax.random.normal(ks[3], (D, D), jnp.float32) * sc,
        "bq": jax.random.normal(ks[4], (1, D), jnp.float32) * sc,
        "bk": jax.random.normal(ks[5], (1, D), jnp.float32) * sc,
        "bv": jax.random.normal(ks[6], (1, D), jnp.float32) * sc,
        "bo": jax.random.normal(ks[7], (1, D), jnp.float32) * sc,
        "w1": jax.random.normal(ks[8], (D, DFF), jnp.float32) * sc,
        "b1": jax.random.normal(ks[9], (1, DFF), jnp.float32) * sc,
        "w2": jax.random.normal(ks[10], (DFF, D), jnp.float32) * sc,
        "b2": jax.random.normal(ks[11], (1, D), jnp.float32) * sc,
        "ln1_a": jnp.array([1.1], jnp.float32),
        "ln1_b": jnp.array([-0.05], jnp.float32),
        "ln2_a": jnp.array([0.9], jnp.float32),
        "ln2_b": jnp.array([0.02], jnp.float32),
    }
    x = jax.random.normal(ks[12], (B, S, D), jnp.float32)

    # Key-padding mask: batch 0 attends to all 8 keys; batch 1 masks out the
    # last 2 key positions (mask == 0 -> -1e9 before softmax).
    valid = jnp.array([8, 6])
    key_mask = (jnp.arange(S)[None, :] < valid[:, None]).astype(jnp.int32)  # (B, S)

    ref = encoder_block_ref(x, key_mask, params, n_heads=H)

    # f32 compute path (tight-ish check; approx reciprocal adds small error).
    out32 = jax.block_until_ready(
        encoder_block_forward(x, key_mask, params, n_heads=H,
                              compute_dtype=jnp.float32))
    assert out32.shape == (B, S, D) and out32.dtype == x.dtype
    assert bool(jnp.all(jnp.isfinite(out32)))
    err32 = float(jnp.max(jnp.abs(out32 - ref)))
    assert jnp.allclose(out32, ref, atol=5e-2, rtol=5e-2), err32

    # bf16 matmul operands, f32 accumulation / softmax / LN stats / residuals.
    out16 = jax.block_until_ready(
        encoder_block_forward(x, key_mask, params, n_heads=H,
                              compute_dtype=jnp.bfloat16))
    assert out16.shape == (B, S, D) and out16.dtype == x.dtype
    assert bool(jnp.all(jnp.isfinite(out16)))
    err16 = float(jnp.max(jnp.abs(out16 - ref)))
    assert jnp.allclose(out16, ref, atol=1.5e-1, rtol=1.5e-1), err16

    print("KERNEL_OK")
</pallas_src>

<mosaic_0001>
module attributes {stable_mosaic.version = 11 : i64} {
  func.func @_ln_qkv_kernel(%arg0: i32, %arg1: memref<16x32xf32, #tpu.memory_space<vmem>>, %arg2: memref<32x32xf32, #tpu.memory_space<vmem>>, %arg3: memref<32x32xf32, #tpu.memory_space<vmem>>, %arg4: memref<32x32xf32, #tpu.memory_space<vmem>>, %arg5: memref<1x32xf32, #tpu.memory_space<vmem>>, %arg6: memref<1x32xf32, #tpu.memory_space<vmem>>, %arg7: memref<1x32xf32, #tpu.memory_space<vmem>>, %arg8: memref<1xf32, #tpu.memory_space<smem>>, %arg9: memref<1xf32, #tpu.memory_space<smem>>, %arg10: memref<16x32xf32, #tpu.memory_space<vmem>>, %arg11: memref<16x32xf32, #tpu.memory_space<vmem>>, %arg12: memref<16x32xf32, #tpu.memory_space<vmem>>) attributes {dimension_semantics = [#tpu.dimension_semantics<parallel>], iteration_bounds = array<i64: 1>, scalar_prefetch = 0 : i64, scratch_operands = 0 : i64, tpu.core_type = #tpu.core_type<tc>, window_params = [{transform_indices = @transform_0, window_bounds = array<i64: 16, 32>}, {pipeline_mode = #tpu.pipeline_mode<synchronous>, transform_indices = @transform_1, window_bounds = array<i64: 32, 32>}, {pipeline_mode = #tpu.pipeline_mode<synchronous>, transform_indices = @transform_2, window_bounds = array<i64: 32, 32>}, {pipeline_mode = #tpu.pipeline_mode<synchronous>, transform_indices = @transform_3, window_bounds = array<i64: 32, 32>}, {pipeline_mode = #tpu.pipeline_mode<synchronous>, transform_indices = @transform_4, window_bounds = array<i64: 1, 32>}, {pipeline_mode = #tpu.pipeline_mode<synchronous>, transform_indices = @transform_5, window_bounds = array<i64: 1, 32>}, {pipeline_mode = #tpu.pipeline_mode<synchronous>, transform_indices = @transform_6, window_bounds = array<i64: 1, 32>}, {transform_indices = @transform_7, window_bounds = array<i64: 1>}, {transform_indices = @transform_8, window_bounds = array<i64: 1>}, {transform_indices = @transform_9, window_bounds = array<i64: 16, 32>}, {transform_indices = @transform_10, window_bounds = array<i64: 16, 32>}, {transform_indices = @transform_11, window_bounds = array<i64: 16, 32>}]} {
    %c0 = arith.constant 0 : index
    %c0_0 = arith.constant 0 : index
    %0 = vector.load %arg1[%c0, %c0_0] : memref<16x32xf32, #tpu.memory_space<vmem>>, vector<16x32xf32>
    %c0_1 = arith.constant 0 : index
    %1 = memref.load %arg8[%c0_1] : memref<1xf32, #tpu.memory_space<smem>>
    %c0_2 = arith.constant 0 : index
    %2 = memref.load %arg9[%c0_2] : memref<1xf32, #tpu.memory_space<smem>>
    %cst = arith.constant dense<0.000000e+00> : vector<16xf32>
    %3 = vector.multi_reduction <add>, %0, %cst [1] : vector<16x32xf32> to vector<16xf32>
    %4 = vector.shape_cast %3 : vector<16xf32> to vector<16x1xf32>
    %cst_3 = arith.constant 3.200000e+01 : f32
    %5 = vector.broadcast %cst_3 : f32 to vector<16x1xf32>
    %6 = arith.divf %4, %5 : vector<16x1xf32>
    %7 = arith.mulf %0, %0 : vector<16x32xf32>
    %cst_4 = arith.constant dense<0.000000e+00> : vector<16xf32>
    %8 = vector.multi_reduction <add>, %7, %cst_4 [1] : vector<16x32xf32> to vector<16xf32>
    %9 = vector.shape_cast %8 : vector<16xf32> to vector<16x1xf32>
    %cst_5 = arith.constant 3.200000e+01 : f32
    %10 = vector.broadcast %cst_5 : f32 to vector<16x1xf32>
    %11 = arith.divf %9, %10 : vector<16x1xf32>
    %12 = arith.mulf %6, %6 : vector<16x1xf32>
    %13 = arith.subf %11, %12 : vector<16x1xf32>
    %cst_6 = arith.constant 1.03225803 : f32
    %14 = vector.broadcast %cst_6 : f32 to vector<16x1xf32>
    %15 = arith.mulf %13, %14 : vector<16x1xf32>
    %cst_7 = arith.constant 0.000000e+00 : f32
    %16 = vector.broadcast %cst_7 : f32 to vector<16x1xf32>
    %17 = arith.maximumf %15, %16 : vector<16x1xf32>
    %18 = math.sqrt %17 : vector<16x1xf32>
    %cst_8 = arith.constant 9.99999997E-7 : f32
    %19 = vector.broadcast %cst_8 : f32 to vector<16x1xf32>
    %20 = arith.addf %18, %19 : vector<16x1xf32>
    %21 = tpu.reciprocal %20 {approx = true} : vector<16x1xf32> -> vector<16x1xf32>
    %22 = vector.broadcast %6 : vector<16x1xf32> to vector<16x32xf32>
    %23 = arith.subf %0, %22 : vector<16x32xf32>
    %24 = vector.broadcast %1 : f32 to vector<16x32xf32>
    %25 = arith.mulf %24, %23 : vector<16x32xf32>
    %26 = vector.broadcast %21 : vector<16x1xf32> to vector<16x32xf32>
    %27 = arith.mulf %25, %26 : vector<16x32xf32>
    %28 = vector.broadcast %2 : f32 to vector<16x32xf32>
    %29 = arith.addf %27, %28 : vector<16x32xf32>
    %c0_9 = arith.constant 0 : index
    %c0_10 = arith.constant 0 : index
    %30 = vector.load %arg2[%c0_9, %c0_10] : memref<32x32xf32, #tpu.memory_space<vmem>>, vector<32x32xf32>
    %cst_11 = arith.constant dense<0.000000e+00> : vector<16x32xf32>
    %31 = tpu.matmul %29, %30, %cst_11 {dimension_numbers = #tpu.dot_dimension_numbers<[1], [0], [0], [1], [0, 0, 1, 1], [], []>} : vector<16x32xf32>, vector<32x32xf32>, vector<16x32xf32> -> vector<16x32xf32>
    %c0_12 = arith.constant 0 : index
    %c0_13 = arith.constant 0 : index
    %32 = vector.load %arg5[%c0_12, %c0_13] : memref<1x32xf32, #tpu.memory_space<vmem>>, vector<1x32xf32>
    %33 = vector.broadcast %32 : vector<1x32xf32> to vector<16x32xf32>
    %34 = arith.addf %31, %33 : vector<16x32xf32>
    %c0_14 = arith.constant 0 : index
    %c0_15 = arith.constant 0 : index
    %35 = vector.load %arg3[%c0_14, %c0_15] : memref<32x32xf32, #tpu.memory_space<vmem>>, vector<32x32xf32>
    %cst_16 = arith.constant dense<0.000000e+00> : vector<16x32xf32>
    %36 = tpu.matmul %29, %35, %cst_16 {dimension_numbers = #tpu.dot_dimension_numbers<[1], [0], [0], [1], [0, 0, 1, 1], [], []>} : vector<16x32xf32>, vector<32x32xf32>, vector<16x32xf32> -> vector<16x32xf32>
    %c0_17 = arith.constant 0 : index
    %c0_18 = arith.constant 0 : index
    %37 = vector.load %arg6[%c0_17, %c0_18] : memref<1x32xf32, #tpu.memory_space<vmem>>, vector<1x32xf32>
    %38 = vector.broadcast %37 : vector<1x32xf32> to vector<16x32xf32>
    %39 = arith.addf %36, %38 : vector<16x32xf32>
    %c0_19 = arith.constant 0 : index
    %c0_20 = arith.constant 0 : index
    %40 = vector.load %arg4[%c0_19, %c0_20] : memref<32x32xf32, #tpu.memory_space<vmem>>, vector<32x32xf32>
    %cst_21 = arith.constant dense<0.000000e+00> : vector<16x32xf32>
    %41 = tpu.matmul %29, %40, %cst_21 {dimension_numbers = #tpu.dot_dimension_numbers<[1], [0], [0], [1], [0, 0, 1, 1], [], []>} : vector<16x32xf32>, vector<32x32xf32>, vector<16x32xf32> -> vector<16x32xf32>
    %c0_22 = arith.constant 0 : index
    %c0_23 = arith.constant 0 : index
    %42 = vector.load %arg7[%c0_22, %c0_23] : memref<1x32xf32, #tpu.memory_space<vmem>>, vector<1x32xf32>
    %43 = vector.broadcast %42 : vector<1x32xf32> to vector<16x32xf32>
    %44 = arith.addf %41, %43 : vector<16x32xf32>
    %cst_24 = arith.constant 0.353553385 : f32
    %45 = vector.broadcast %cst_24 : f32 to vector<16x32xf32>
    %46 = arith.mulf %34, %45 : vector<16x32xf32>
    %c0_25 = arith.constant 0 : index
    %c0_26 = arith.constant 0 : index
    %47 = vector.load %arg10[%c0_25, %c0_26] : memref<16x32xf32, #tpu.memory_space<vmem>>, vector<16x32xf32>
    tpu.vector_store %arg10[%c0_25, %c0_26], %46 {strides = array<i32>} : memref<16x32xf32, #tpu.memory_space<vmem>>, vector<16x32xf32>,
    %c0_27 = arith.constant 0 : index
    %c0_28 = arith.constant 0 : index
    %48 = vector.load %arg11[%c0_27, %c0_28] : memref<16x32xf32, #tpu.memory_space<vmem>>, vector<16x32xf32>
    tpu.vector_store %arg11[%c0_27, %c0_28], %39 {strides = array<i32>} : memref<16x32xf32, #tpu.memory_space<vmem>>, vector<16x32xf32>,
    %c0_29 = arith.constant 0 : index
    %c0_30 = arith.constant 0 : index
    %49 = vector.load %arg12[%c0_29, %c0_30] : memref<16x32xf32, #tpu.memory_space<vmem>>, vector<16x32xf32>
    tpu.vector_store %arg12[%c0_29, %c0_30], %44 {strides = array<i32>} : memref<16x32xf32, #tpu.memory_space<vmem>>, vector<16x32xf32>,
    return
  }
  func.func @transform_0(%arg0: i32) -> (i32, i32) {
    %c0_i32 = arith.constant 0 : i32
    %c0_i32_0 = arith.constant 0 : i32
    return %arg0, %c0_i32 : i32, i32
  }
  func.func @transform_1(%arg0: i32) -> (i32, i32) {
    %c0_i32 = arith.constant 0 : i32
    %c0_i32_0 = arith.constant 0 : i32
    %c0_i32_1 = arith.constant 0 : i32
    return %c0_i32, %c0_i32_0 : i32, i32
  }
  func.func @transform_2(%arg0: i32) -> (i32, i32) {
    %c0_i32 = arith.constant 0 : i32
    %c0_i32_0 = arith.constant 0 : i32
    %c0_i32_1 = arith.constant 0 : i32
    return %c0_i32, %c0_i32_0 : i32, i32
  }
  func.func @transform_3(%arg0: i32) -> (i32, i32) {
    %c0_i32 = arith.constant 0 : i32
    %c0_i32_0 = arith.constant 0 : i32
    %c0_i32_1 = arith.constant 0 : i32
    return %c0_i32, %c0_i32_0 : i32, i32
  }
  func.func @transform_4(%arg0: i32) -> (i32, i32) {
    %c0_i32 = arith.constant 0 : i32
    %c0_i32_0 = arith.constant 0 : i32
    %c0_i32_1 = arith.constant 0 : i32
    return %c0_i32, %c0_i32_0 : i32, i32
  }
  func.func @transform_5(%arg0: i32) -> (i32, i32) {
    %c0_i32 = arith.constant 0 : i32
    %c0_i32_0 = arith.constant 0 : i32
    %c0_i32_1 = arith.constant 0 : i32
    return %c0_i32, %c0_i32_0 : i32, i32
  }
  func.func @transform_6(%arg0: i32) -> (i32, i32) {
    %c0_i32 = arith.constant 0 : i32
    %c0_i32_0 = arith.constant 0 : i32
    %c0_i32_1 = arith.constant 0 : i32
    return %c0_i32, %c0_i32_0 : i32, i32
  }
  func.func @transform_7(%arg0: i32) -> i32 {
    %c0_i32 = arith.constant 0 : i32
    %c0_i32_0 = arith.constant 0 : i32
    return %c0_i32 : i32
  }
  func.func @transform_8(%arg0: i32) -> i32 {
    %c0_i32 = arith.constant 0 : i32
    %c0_i32_0 = arith.constant 0 : i32
    return %c0_i32 : i32
  }
  func.func @transform_9(%arg0: i32) -> (i32, i32) {
    %c0_i32 = arith.constant 0 : i32
    %c0_i32_0 = arith.constant 0 : i32
    return %arg0, %c0_i32 : i32, i32
  }
  func.func @transform_10(%arg0: i32) -> (i32, i32) {
    %c0_i32 = arith.constant 0 : i32
    %c0_i32_0 = arith.constant 0 : i32
    return %arg0, %c0_i32 : i32, i32
  }
  func.func @transform_11(%arg0: i32) -> (i32, i32) {
    %c0_i32 = arith.constant 0 : i32
    %c0_i32_0 = arith.constant 0 : i32
    return %arg0, %c0_i32 : i32, i32
  }
}

</mosaic_0001>

<bundles_post_ra>
// kernel: tpu_custom_call.1
= control target key start
LH: loop header
LB: loop body
LE: loop exit
PB: predicated region body
PF: predicated region fallthrough
CT: control target
= control target key end

     0   :  { %19 = vsyncpa [#allocation5], 0  ;;  %s857_s0 = inlined_call_operand.hbm [shape: f32[16,32], index: 0, kind: input, shape index: {}]   ;;  %s858_s1 = inlined_call_operand.hbm [shape: f32[32,32], index: 1, kind: input, shape index: {}]   ;;  %s859_s2 = inlined_call_operand.hbm [shape: f32[32,32], index: 2, kind: input, shape index: {}]   ;;  %s860_s3 = inlined_call_operand.hbm [shape: f32[32,32], index: 3, kind: input, shape index: {}]   ;;  %s861_s4 = inlined_call_operand.vmem [shape: f32[1,32], index: 4, kind: input, shape index: {}]   ;;  %s862_s5 = inlined_call_operand.vmem [shape: f32[1,32], index: 5, kind: input, shape index: {}]   ;;  %s863_s6 = inlined_call_operand.vmem [shape: f32[1,32], index: 6, kind: input, shape index: {}]   ;;  %s864_s7 = inlined_call_operand.<no memory space> [shape: f32[1], index: 7, kind: input, shape index: {}]   ;;  %s865_s8 = inlined_call_operand.<no memory space> [shape: f32[1], index: 8, kind: input, shape index: {}]   ;;  %s866_s9 = inlined_call_operand.hbm [shape: f32[16,32], index: 9, kind: output, shape index: {0}]   ;;  %s867_s10 = inlined_call_operand.hbm [shape: f32[16,32], index: 10, kind: output, shape index: {1}]   ;;  %s868_s11 = inlined_call_operand.hbm [shape: f32[16,32], index: 11, kind: output, shape index: {2}]  }
   0x1   :  { %20 = vsyncpa [#allocation8], 0 }
   0x2   :  { %21 = vsyncpa [#allocation11], 0 }
   0x3   :  { %22 = vsyncpa [#allocation6], 0 }
   0x4   :  { %23 = vsyncpa [#allocation14], 0  ;;  %s703_s17 = smov [#allocation7]   ;;  %s704_s19 = smov [#allocation4]  }
   0x5   :  { %s41_s18 = sshll.u32 %s703_s17, 4  ;;  %s29_s20 = sshll.u32 %s704_s19, 4  ;;  %s42_s18 = int_to_ptr.vmem [resolvable:$true] %s41_s18  ;;  %s30_s20 = int_to_ptr.vmem [resolvable:$true] %s29_s20 }
   0x6   :  { %s561_s21 = scalar_lea.vmem %s42_s18, 512  ;;  %p566_p1 = scmp.lt.s32.totalorder %s42_s18, %s42_s18 }
   0x7   :  { %p562_p0 = scmp.ne.s32.totalorder %s42_s18, %s561_s21  ;;  %p567_p2 = scmp.lt.s32.totalorder %s561_s21, %s561_s21 }
   0x9   :  { %p568_p3 = por %p567_p2, %p566_p1 }
   0xb   :  { %p569_p4 = pnand %p568_p3, %p562_p0 }
   0xd   :  { %572 = shalt.err (!%p569_p4)
}
   0xe   :  { %s705_s22 = smov 128   ;;  %s706_s23 = smov 8  }
   0xf   :  { %47 = dma.hbm_to_vmem [thread:$0]  %s858_s1, 512, %s42_s18, [#allocation8], %s705_s22, %s705_s22, %s706_s23  }
  0x10   :  { %s581_s26 = scalar_lea.vmem %s30_s20, 256  ;;  %p586_p6 = scmp.lt.s32.totalorder %s30_s20, %s30_s20 }
  0x11   :  { %p582_p5 = scmp.ne.s32.totalorder %s30_s20, %s581_s26  ;;  %p587_p7 = scmp.lt.s32.totalorder %s581_s26, %s581_s26 }
  0x13   :  { %p588_p8 = por %p587_p7, %p586_p6 }
  0x15   :  { %p589_p9 = pnand %p588_p8, %p582_p5 }
  0x17   :  { %592 = shalt.err (!%p589_p9)
}
  0x18   :  { %35 = dma.hbm_to_vmem [thread:$0]  %s857_s0, 256, %s30_s20, [#allocation5], %s705_s22, %s705_s22, %s706_s23  }
  0x19   :  { %s707_s29 = smov [#allocation9]   ;;  %s708_s12 = smov [#allocation10]  }
  0x1a   :  { %s53_s30 = sshll.u32 %s707_s29, 4  ;;  %s65_s13 = sshll.u32 %s708_s12, 4  ;;  %s54_s30 = int_to_ptr.vmem [resolvable:$true] %s53_s30  ;;  %s66_s13 = int_to_ptr.vmem [resolvable:$true] %s65_s13 }
  0x1b   :  { %s601_s1 = scalar_lea.vmem %s54_s30, 512  ;;  %p606_p11 = scmp.lt.s32.totalorder %s54_s30, %s54_s30 }
  0x1c   :  { %p602_p10 = scmp.ne.s32.totalorder %s54_s30, %s601_s1  ;;  %p607_p12 = scmp.lt.s32.totalorder %s601_s1, %s601_s1 }
  0x1e   :  { %p608_p13 = por %p607_p12, %p606_p11 }
  0x20   :  { %p609_p0 = pnand %p608_p13, %p602_p10 }
  0x22   :  { %612 = shalt.err (!%p609_p0)
}
  0x23   :  { %59 = dma.hbm_to_vmem [thread:$0]  %s859_s2, 512, %s54_s30, [#allocation8], %s705_s22, %s705_s22, %s706_s23  }
  0x24   :  { %s621_s0 = scalar_lea.vmem %s66_s13, 512  ;;  %p626_p2 = scmp.lt.s32.totalorder %s66_s13, %s66_s13 }
  0x25   :  { %p622_p1 = scmp.ne.s32.totalorder %s66_s13, %s621_s0  ;;  %p627_p3 = scmp.lt.s32.totalorder %s621_s0, %s621_s0 }
  0x27   :  { %p628_p4 = por %p627_p3, %p626_p2 }
  0x29   :  { %p629_p5 = pnand %p628_p4, %p622_p1 }
  0x2b   :  { %632 = shalt.err (!%p629_p5)
}
  0x2c   :  { %71 = dma.hbm_to_vmem [thread:$0]  %s860_s3, 512, %s66_s13, [#allocation11], %s705_s22, %s705_s22, %s706_s23  }
  0x2d   :  { %693 = dma.done.wait [#allocation5], 256  }
  0x2e   :  { %694 = vsyncadd [#allocation5], 4294967040 }
  0x2f   :  { %695 = dma.done.wait [#allocation8], 1024  }
  0x30   :  { %696 = vsyncadd [#allocation8], 4294966272 }
  0x31   :  { %697 = dma.done.wait [#allocation11], 512  }
  0x32   :  { %698 = vsyncadd [#allocation11], 4294966784  ;;  %vm98_vm0 = vcmask 261120   ;;  %v796_v0 = vld [vmem:[#allocation4] sm:$0xff]  ;;  %v798_v1 = vld [vmem:[#allocation4 + $0x8] sm:$0xff]  ;;  %v146_v46 = vstv %s864_s7  ;;  %v151_v50 = vstv %s865_s8  ;;  %s709_s24 = smov [#allocation13]  }
  0x33   :  { %v99_v2 = vsel %vm98_vm0, %v796_v0, 0.0  ;;  %v108_v3 = vmul.f32 %v796_v0, %v796_v0  ;;  %v109_v4 = vmul.f32 %v798_v1, %v798_v1  ;;  %v102_v6 = vsel %vm98_vm0, %v798_v1, 0.0  ;;  %v157_v8 = vld [vmem:[#allocation7 + $0x18] sm:$0xff]  ;;  %v156_v10 = vld [vmem:[#allocation7 + $0x10] sm:$0xff]  ;;  %v155_v12 = vld [vmem:[#allocation7 + $0x8] sm:$0xff]  ;;  %s443_s25 = sshll.u32 %s709_s24, 4  ;;  %s444_s25 = int_to_ptr.vmem [resolvable:$true] %s443_s25 }
  0x34   :  { %100 = vadd.xlane.f32.xlu0 %v99_v2  ;;  %v249_v9 = vld [vmem:[#allocation9 + $0x18] sm:$0xff]  ;;  %503 = vmatprep.subr.mxu0 %v157_v8  ;;  %v248_v11 = vld [vmem:[#allocation9 + $0x10] sm:$0xff]  ;;  %v247_v13 = vld [vmem:[#allocation9 + $0x8] sm:$0xff]  ;;  %s710_s26 = smov [#allocation12]   ;;  %s633_s28 = scalar_lea.vmem %s444_s25, 256 }
  0x35   :  { %v110_v5 = vsel %vm98_vm0, %v108_v3, 0.0  ;;  %v113_v7 = vsel %vm98_vm0, %v109_v4, 0.0  ;;  %514 = vmatprep.subr.mxu1 %v249_v9  ;;  %504 = vmatpush3.msra.mxu0 %v157_v8  ;;  %v154_v14 = vld [vmem:[#allocation7] sm:$0xff]  ;;  %v335_v16 = vld [vmem:[#allocation10 + $0x18] sm:$0xff]  ;;  %v334_v57 = vld [vmem:[#allocation10 + $0x10] sm:$0xff]  ;;  %s431_s27 = sshll.u32 %s710_s26, 4  ;;  %p634_p6 = scmp.ne.s32.totalorder %s444_s25, %s633_s28  ;;  %s432_s27 = int_to_ptr.vmem [resolvable:$true] %s431_s27 }
  0x36   :  { %111 = vadd.xlane.f32.xlu1 %v110_v5  ;;  %515 = vmatpush3.msra.mxu1 %v249_v9  ;;  %v246_v15 = vld [vmem:[#allocation9] sm:$0xff]  ;;  %v333_v58 = vld [vmem:[#allocation10 + $0x8] sm:$0xff]  ;;  %v476_v60 = vld [vmem:[%s861_s4] ss:$0 sm:$0xff]  ;;  %p638_p7 = scmp.lt.s32.totalorder %s444_s25, %s444_s25  ;;  %p639_p8 = scmp.lt.s32.totalorder %s633_s28, %s633_s28 }
  0x37   :  { %505 = vmatprep.subr.mxu0 %v156_v10  ;;  %516 = vmatprep.subr.mxu1 %v248_v11  ;;  %v332_v59 = vld [vmem:[#allocation10] sm:$0xff]  ;;  %v479_v61 = vld [vmem:[%s862_s5] ss:$0 sm:$0xff] }
  0x38   :  { %103 = vadd.xlane.f32.xlu0 %v102_v6  ;;  %506 = vmatpush3.msra.mxu0 %v156_v10  ;;  %v482_v8 = vld [vmem:[%s863_s6] ss:$0 sm:$0xff]  ;;  %p640_p9 = por %p639_p8, %p638_p7 }
  0x39   :  { %517 = vmatpush3.msra.mxu1 %v248_v11  ;;  %507 = vmatprep.subr.mxu0 %v155_v12 }
  0x3a   :  { %114 = vadd.xlane.f32.xlu1 %v113_v7  ;;  %508 = vmatpush3.msra.mxu0 %v155_v12  ;;  %p641_p10 = pnand %p640_p9, %p634_p6 }
  0x3b   :  { %518 = vmatprep.subr.mxu1 %v247_v13  ;;  %509 = vmatprep.subr.mxu0 %v154_v14 }
  0x3c   :  { %519 = vmatpush3.msra.mxu1 %v247_v13  ;;  %510 = vmatpush3.msra.mxu0 %v154_v14 }
  0x3d   :  { %520 = vmatprep.subr.mxu1 %v246_v15  ;;  %525 = vmatprep.subr.mxu0 %v335_v16 }
  0x3e   :  { %521 = vmatpush3.msra.mxu1 %v246_v15 }
  0xbd   :  { %v101_v17 = vpop.xlane.xlu0 %100 }
  0xbe   :  { %v106_v18 = vmul.f32 0.03125, %v101_v17 }
  0xbf   :  { %v112_v19 = vpop.xlane.xlu1 %111 }
  0xc0   :  { %v118_v20 = vmul.f32 %v106_v18, %v106_v18  ;;  %v116_v21 = vmul.f32 0.03125, %v112_v19  ;;  %v144_v45 = vsub.f32 %v796_v0, %v106_v18 }
  0xc1   :  { %v104_v22 = vpop.xlane.xlu0 %103 }
  0xc2   :  { %v120_v23 = vsub.f32 %v116_v21, %v118_v20  ;;  %v107_v24 = vmul.f32 0.03125, %v104_v22  ;;  %v147_v47 = vmul.f32 %v146_v46, %v144_v45 }
  0xc3   :  { %v115_v25 = vpop.xlane.xlu1 %114 }
  0xc4   :  { %v122_v26 = vmul.f32 1.032258, %v120_v23  ;;  %v119_v27 = vmul.f32 %v107_v24, %v107_v24  ;;  %v117_v28 = vmul.f32 0.03125, %v115_v25  ;;  %v145_v49 = vsub.f32 %v798_v1, %v107_v24 }
  0xc6   :  { %v124_v29 = vmax.f32 %v122_v26, 0.0  ;;  %v121_v30 = vsub.f32 %v117_v28, %v119_v27  ;;  %v148_v53 = vmul.f32 %v146_v46, %v145_v49 }
  0xc8   :  { %545 = vrsqrt.f32 %v124_v29  ;;  %v123_v31 = vmul.f32 1.032258, %v121_v30  ;;  %vm128_vm1 = vcmp.eq.f32.partialorder %v124_v29, inf  ;;  %v131_v35 = vand.u32 2147483648, %v124_v29 }
  0xc9   :  { %vm130_vm2 = vcmp.eq.f32.partialorder %v124_v29, 0.0 }
  0xca   :  { %v125_v32 = vmax.f32 %v123_v31, 0.0 }
  0xcc   :  { %547 = vrsqrt.f32 %v125_v32  ;;  %vm135_vm3 = vcmp.eq.f32.partialorder %v125_v32, inf  ;;  %v138_v41 = vand.u32 2147483648, %v125_v32  ;;  %vm137_vm4 = vcmp.eq.f32.partialorder %v125_v32, 0.0 }
  0xd5   :  { %v546_v33 = vpop.eup %545 }
  0xd6   :  { %v127_v34 = vmul.f32 %v546_v33, %v124_v29 }
  0xd8   :  { %v129_v36 = vsel %vm128_vm1, %v124_v29, %v127_v34 }
  0xd9   :  { %v132_v37 = vsel %vm130_vm2, %v131_v35, %v129_v36  ;;  %v548_v38 = vpop.eup %547 }
  0xda   :  { %v140_v39 = vadd.f32 1e-06, %v132_v37  ;;  %v134_v40 = vmul.f32 %v548_v38, %v125_v32 }
  0xdc   :  { %549 = vrcp.f32 %v140_v39  ;;  %v136_v42 = vsel %vm135_vm3, %v125_v32, %v134_v40 }
  0xdd   :  { %v139_v43 = vsel %vm137_vm4, %v138_v41, %v136_v42 }
  0xde   :  { %v141_v44 = vadd.f32 1e-06, %v139_v43 }
  0xe0   :  { %551 = vrcp.f32 %v141_v44 }
  0xe9   :  { %v550_v48 = vpop.eup %549 }
  0xea   :  { %v149_v51 = vmul.f32 %v550_v48, %v147_v47 }
  0xec   :  { %v152_v52 = vadd.f32 %v151_v50, %v149_v51 }
  0xed   :  { %v552_v54 = vpop.eup %551 }
  0xee   :  { %511 = vmatprep.mubr.msk.f32.mxu0 %vm98_vm0, %v152_v52  ;;  %522 = vmatprep.mubr.msk.f32.mxu1 %vm98_vm0, %v152_v52  ;;  %v150_v55 = vmul.f32 %v552_v54, %v148_v53 }
  0xf0   :  { %v153_v56 = vadd.f32 %v151_v50, %v150_v55 }
  0xf2   :  { %512 = vmatmul.mubr.msk.f32.vlgmr.msra.gmra.mxu0 %vm98_vm0, %v153_v56  ;;  %523 = vmatmul.mubr.msk.f32.vlgmr.msra.gmra.mxu1 %vm98_vm0, %v153_v56 }
  0xf3   :  { %526 = vmatpush3.msra.mxu0 %v335_v16  ;;  %533 = vmatprep.mubr.msk.f32.mxu0 %vm98_vm0, %v152_v52 }
  0xf4   :  { %527 = vmatprep.subr.mxu0 %v334_v57 }
  0xf5   :  { %528 = vmatpush3.msra.mxu0 %v334_v57 }
  0xf6   :  { %529 = vmatprep.subr.mxu0 %v333_v58 }
  0xf7   :  { %530 = vmatpush3.msra.mxu0 %v333_v58 }
  0xf8   :  { %531 = vmatprep.subr.mxu0 %v332_v59 }
  0xf9   :  { %532 = vmatpush3.msra.mxu0 %v332_v59 }
  0xfa   :  { %534 = vmatmul.mubr.msk.f32.vlgmr.msra.gmra.mxu0 %vm98_vm0, %v153_v56 }
 0x1b2   :  { %v513_v62 = vpop.f32.mrf.mxu0  ;;  %v524_v63 = vpop.f32.mrf.mxu1 }
 0x1b3   :  { %v243_v0 = vadd.f32 %v513_v62, %v476_v60  ;;  %v329_v1 = vadd.f32 %v524_v63, %v479_v61 }
 0x1b4   :  { %v237_v2 = vpop.f32.mrf.mxu0  ;;  %v323_v3 = vpop.f32.mrf.mxu1 }
 0x1b5   :  { %v419_v4 = vmul.f32 0.35355338, %v243_v0  ;;  %423 = vst.msk [vmem:[#allocation13 + $0x8] sm:$0xff] %vm98_vm0, %v329_v1  ;;  %v238_v5 = vadd.f32 %v476_v60, %v237_v2  ;;  %v324_v6 = vadd.f32 %v479_v61, %v323_v3 }
 0x1b7   :  { %421 = vst.msk [vmem:[#allocation12 + $0x8] sm:$0xff] %vm98_vm0, %v419_v4  ;;  %v418_v7 = vmul.f32 0.35355338, %v238_v5  ;;  %422 = vst.msk [vmem:[#allocation13] sm:$0xff] %vm98_vm0, %v324_v6 }
 0x1b8   :  { %644 = shalt.err (!%p641_p10)
}
 0x1b9   :  { %449 = dma.vmem_to_hbm [thread:$0]  %s444_s25, 256, %s867_s10, [#allocation14], %s705_s22, %s705_s22, %s706_s23   ;;  %420 = vst.msk [vmem:[#allocation12] sm:$0xff] %vm98_vm0, %v418_v7 }
 0x1ba   :  { %s711_s12 = smov [#allocation15]   ;;  %v535_v9 = vpop.f32.mrf.mxu0  ;;  %s653_s6 = scalar_lea.vmem %s432_s27, 256 }
 0x1bb   :  { %s455_s13 = sshll.u32 %s711_s12, 4  ;;  %p654_p11 = scmp.ne.s32.totalorder %s432_s27, %s653_s6  ;;  %s456_s13 = int_to_ptr.vmem [resolvable:$true] %s455_s13 }
 0x1bc   :  { %p658_p12 = scmp.lt.s32.totalorder %s432_s27, %s432_s27  ;;  %p659_p13 = scmp.lt.s32.totalorder %s653_s6, %s653_s6 }
 0x1be   :  { %p660_p0 = por %p659_p13, %p658_p12 }
 0x1c0   :  { %p661_p1 = pnand %p660_p0, %p654_p11 }
 0x1c2   :  { %664 = shalt.err (!%p661_p1)
}
 0x1c3   :  { %437 = dma.vmem_to_hbm [thread:$0]  %s432_s27, 256, %s866_s9, [#allocation6], %s705_s22, %s705_s22, %s706_s23   ;;  %v415_v10 = vadd.f32 %v535_v9, %v482_v8  ;;  %v409_v11 = vpop.f32.mrf.mxu0 }
 0x1c4   :  { %v410_v12 = vadd.f32 %v482_v8, %v409_v11  ;;  %s673_s10 = scalar_lea.vmem %s456_s13, 256  ;;  %p678_p3 = scmp.lt.s32.totalorder %s456_s13, %s456_s13 }
 0x1c5   :  { %425 = vst.msk [vmem:[#allocation15 + $0x8] sm:$0xff] %vm98_vm0, %v415_v10  ;;  %p674_p2 = scmp.ne.s32.totalorder %s456_s13, %s673_s10  ;;  %p679_p4 = scmp.lt.s32.totalorder %s673_s10, %s673_s10 }
 0x1c6   :  { %424 = vst.msk [vmem:[#allocation15] sm:$0xff] %vm98_vm0, %v410_v12 }
 0x1c7   :  { %p680_p5 = por %p679_p4, %p678_p3 }
 0x1c9   :  { %p681_p6 = pnand %p680_p5, %p674_p2 }
 0x1cb   :  { %684 = shalt.err (!%p681_p6)
}
 0x1cc   :  { %461 = dma.vmem_to_hbm [thread:$0]  %s456_s13, 256, %s868_s11, [#allocation14], %s705_s22, %s705_s22, %s706_s23  }
 0x1cd   :  { %699 = dma.done.wait [#allocation6], 256  }
 0x1ce   :  { %700 = vsyncadd [#allocation6], 4294967040 }
 0x1cf   :  { %701 = dma.done.wait [#allocation14], 512  }
 0x1d0   :  { %702 = vsyncadd [#allocation14], 4294966784 }
 0x1d1   :  { %471 = vsyncpa [#allocation5], 1 }
 0x1d2   :  { %472 = vsyncpa [#allocation8], 1 }
 0x1d3   :  { %473 = vsyncpa [#allocation11], 1 }
 0x1d4   :  { %474 = vsyncpa [#allocation6], 1 }
 0x1d5   :  { %475 = vsyncpa [#allocation14], 1 }

</bundles_post_ra>
